<compile_context>
chip_gen: v7x
topology: tpu7x:2x2x1
jax: 0.10.0
libtpu: 0.0.40
codegen_flags: <defaults>
</compile_context>

<pallas_src>
import functools

import jax
import jax.numpy as jnp
from jax import lax
from jax.experimental import pallas as pl
from jax.experimental.pallas import tpu as pltpu

BN_EPS = 1e-5


def _transition_kernel(x_ref, w_ref, b_ref, o_ref, *, H, W):
    """x_ref: (1, Cin, H*W); w_ref: (Cin, Cout) bf16; b_ref: (1, Cout) f32;
    o_ref: (1, Cout, Hp*Wp) f32."""
    Hp, Wp = H // 2, W // 2
    Cin = x_ref.shape[1]

    # (Cin, H*W) tile with H*W on lanes (lane-dense DMA); compute in f32.
    x = x_ref[0].astype(jnp.float32)                     # (Cin, HW)

    # In-kernel layout change: spatial -> sublanes, channels -> lanes (XLU transpose,
    # no wrapper HBM transpose needed).
    xt = x.T                                             # (HW, Cin)

    # --- AvgPool2d(2, 2) FIRST (commutes with the 1x1 conv): VPU adds only. ---
    # H-direction: image rows 2i and 2i+1 are the two W-sized halves of each row of
    # the (Hp, 2W, Cin) regrouped view (order-preserving reshape, lane dim untouched).
    a = xt.reshape(Hp, 2 * W, Cin)
    rows = a[:, :W, :] + a[:, W:, :]                     # (Hp, W, Cin)
    # W-direction: adjacent column pairs.
    p = rows.reshape(Hp * Wp, 2, Cin)
    pooled = (p[:, 0, :] + p[:, 1, :]) * 0.25            # (Hp*Wp, Cin)

    # --- 1x1 conv with BN pre-folded into w/b: bf16 MXU matmul, f32 accumulation. ---
    y = jnp.dot(pooled.astype(jnp.bfloat16), w_ref[...],
                preferred_element_type=jnp.float32)      # (Hp*Wp, Cout)
    y = y + b_ref[...]                                   # (Hp*Wp, Cout)

    # Store channels-first so the wrapper's reshape back to NCHW is free.
    o_ref[0] = y.T.astype(o_ref.dtype)                   # (Cout, Hp*Wp)


@jax.jit
def transition_layer_forward(x_nchw, gamma, beta, running_mean, running_var,
                             conv_w, conv_b):
    """x_nchw: (N, Cin, H, W) float32.  Returns (N, Cout, H//2, W//2) float32."""
    N, Cin, H, W = x_nchw.shape
    Cout = conv_w.shape[0]
    assert H % 2 == 0 and W % 2 == 0, "AvgPool2d(2,2) path assumes even H and W"
    Hp, Wp = H // 2, W // 2
    HW, HWp = H * W, Hp * Wp

    # Free reshape only (no transpose, no extra HBM pass): NCHW -> (N, Cin, H*W).
    x = x_nchw.reshape(N, Cin, HW)

    # Fold eval-mode BatchNorm into the 1x1 conv (f32 math; weight cast to bf16 for MXU).
    scale = gamma * lax.rsqrt(running_var + BN_EPS)            # (Cin,)
    w_mat = conv_w.reshape(Cout, Cin).T                        # (Cin, Cout)
    w_fold = (w_mat * scale[:, None]).astype(jnp.bfloat16)     # (Cin, Cout)
    b_fold = (conv_b + (beta - running_mean * scale) @ w_mat).reshape(1, Cout)  # f32

    kernel = functools.partial(_transition_kernel, H=H, W=W)

    out = pl.pallas_call(
        kernel,
        out_shape=jax.ShapeDtypeStruct((N, Cout, HWp), jnp.float32),
        grid_spec=pltpu.PrefetchScalarGridSpec(
            num_scalar_prefetch=0,
            grid=(N,),
            in_specs=[
                pl.BlockSpec((1, Cin, HW), lambda n: (n, 0, 0)),   # x (one image)
                pl.BlockSpec((Cin, Cout), lambda n: (0, 0)),       # folded conv weight
                pl.BlockSpec((1, Cout), lambda n: (0, 0)),         # folded conv bias
            ],
            out_specs=pl.BlockSpec((1, Cout, HWp), lambda n: (n, 0, 0)),
        ),
        compiler_params=pltpu.CompilerParams(
            dimension_semantics=("parallel",),
            vmem_limit_bytes=32 * 1024 * 1024),
    )(x, w_fold, b_fold)

    # Free reshape back to NCHW: (N, Cout, Hp*Wp) -> (N, Cout, Hp, Wp).
    return out.reshape(N, Cout, Hp, Wp)


def _reference(x_nchw, gamma, beta, running_mean, running_var, conv_w, conv_b):
    """Pure-JAX reference mirroring PyTorch (eval-mode BN, 1x1 conv, 2x2 avgpool)."""
    s = gamma / jnp.sqrt(running_var + BN_EPS)
    xb = (x_nchw - running_mean[None, :, None, None]) * s[None, :, None, None] \
        + beta[None, :, None, None]
    y = jnp.einsum("nchw,oc->nohw", xb,
                   conv_w.reshape(conv_w.shape[0], conv_w.shape[1]))
    y = y + conv_b[None, :, None, None]
    N, C, H, W = y.shape
    y = y.reshape(N, C, H // 2, 2, W // 2, 2).mean(axis=(3, 5))
    return y


if __name__ == "__main__":
    key = jax.random.PRNGKey(0)
    k_x, k_g, k_b, k_m, k_v, k_w, k_cb = jax.random.split(key, 7)

    N, Cin, H, W = 2, 4, 16, 16
    theta = 0.5
    Cout = int(theta * Cin)

    x = jax.random.normal(k_x, (N, Cin, H, W), dtype=jnp.float32)

    # Deterministic synthetic parameters (shapes per nn.BatchNorm2d / nn.Conv2d(1x1)).
    gamma = 1.0 + 0.1 * jax.random.normal(k_g, (Cin,), dtype=jnp.float32)
    beta = 0.1 * jax.random.normal(k_b, (Cin,), dtype=jnp.float32)
    running_mean = 0.05 * jax.random.normal(k_m, (Cin,), dtype=jnp.float32)
    running_var = 1.0 + 0.1 * jax.nn.softplus(jax.random.normal(k_v, (Cin,), dtype=jnp.float32))
    conv_w = jax.random.normal(k_w, (Cout, Cin, 1, 1), dtype=jnp.float32) * (1.0 / jnp.sqrt(Cin))
    conv_b = 0.1 * jax.random.normal(k_cb, (Cout,), dtype=jnp.float32)

    out = transition_layer_forward(x, gamma, beta, running_mean, running_var,
                                   conv_w, conv_b)
    out = jax.block_until_ready(out)

    ref = _reference(x, gamma, beta, running_mean, running_var, conv_w, conv_b)

    assert out.shape == (N, Cout, H // 2, W // 2), out.shape
    # bf16 MXU inputs (f32 accumulation) -> relaxed tolerance vs the pure-f32 reference.
    assert jnp.allclose(out, ref, atol=2e-2, rtol=2e-2), float(jnp.max(jnp.abs(out - ref)))

    print("KERNEL_OK")
</pallas_src>

<mosaic_0001>
module attributes {stable_mosaic.version = 11 : i64} {
  func.func @_transition_kernel(%arg0: i32, %arg1: memref<1x4x256xf32, #tpu.memory_space<vmem>>, %arg2: memref<4x2xbf16, #tpu.memory_space<vmem>>, %arg3: memref<1x2xf32, #tpu.memory_space<vmem>>, %arg4: memref<1x2x64xf32, #tpu.memory_space<vmem>>) attributes {dimension_semantics = [#tpu.dimension_semantics<parallel>], iteration_bounds = array<i64: 2>, scalar_prefetch = 0 : i64, scratch_operands = 0 : i64, tpu.core_type = #tpu.core_type<tc>, window_params = [{transform_indices = @transform_0, window_bounds = array<i64: 1, 4, 256>}, {pipeline_mode = #tpu.pipeline_mode<synchronous>, transform_indices = @transform_1, window_bounds = array<i64: 4, 2>}, {pipeline_mode = #tpu.pipeline_mode<synchronous>, transform_indices = @transform_2, window_bounds = array<i64: 1, 2>}, {transform_indices = @transform_3, window_bounds = array<i64: 1, 2, 64>}]} {
    %c0 = arith.constant 0 : index
    %c0_0 = arith.constant 0 : index
    %c0_1 = arith.constant 0 : index
    %0 = vector.load %arg1[%c0, %c0_0, %c0_1] : memref<1x4x256xf32, #tpu.memory_space<vmem>>, vector<1x4x256xf32>
    %1 = vector.shape_cast %0 : vector<1x4x256xf32> to vector<4x256xf32>
    %2 = tpu.transpose %1, [1, 0] : vector<4x256xf32> -> vector<256x4xf32>
    %3 = vector.shape_cast %2 : vector<256x4xf32> to vector<8x32x4xf32>
    %4 = vector.extract_strided_slice %3 {offsets = [0, 0, 0], sizes = [8, 16, 4], strides = [1, 1, 1]} : vector<8x32x4xf32> to vector<8x16x4xf32>
    %5 = vector.extract_strided_slice %3 {offsets = [0, 16, 0], sizes = [8, 16, 4], strides = [1, 1, 1]} : vector<8x32x4xf32> to vector<8x16x4xf32>
    %6 = arith.addf %4, %5 : vector<8x16x4xf32>
    %7 = vector.shape_cast %6 : vector<8x16x4xf32> to vector<64x2x4xf32>
    %8 = vector.extract_strided_slice %7 {offsets = [0, 0, 0], sizes = [64, 1, 4], strides = [1, 1, 1]} : vector<64x2x4xf32> to vector<64x1x4xf32>
    %9 = vector.shape_cast %8 : vector<64x1x4xf32> to vector<64x4xf32>
    %10 = vector.extract_strided_slice %7 {offsets = [0, 1, 0], sizes = [64, 1, 4], strides = [1, 1, 1]} : vector<64x2x4xf32> to vector<64x1x4xf32>
    %11 = vector.shape_cast %10 : vector<64x1x4xf32> to vector<64x4xf32>
    %12 = arith.addf %9, %11 : vector<64x4xf32>
    %cst = arith.constant 2.500000e-01 : f32
    %13 = vector.broadcast %cst : f32 to vector<64x4xf32>
    %14 = arith.mulf %12, %13 : vector<64x4xf32>
    %15 = arith.truncf %14 : vector<64x4xf32> to vector<64x4xbf16>
    %c0_2 = arith.constant 0 : index
    %c0_3 = arith.constant 0 : index
    %16 = vector.load %arg2[%c0_2, %c0_3] : memref<4x2xbf16, #tpu.memory_space<vmem>>, vector<4x2xbf16>
    %cst_4 = arith.constant dense<0.000000e+00> : vector<64x2xf32>
    %17 = tpu.matmul %15, %16, %cst_4 {dimension_numbers = #tpu.dot_dimension_numbers<[1], [0], [0], [1], [0, 0, 1, 1], [], []>} : vector<64x4xbf16>, vector<4x2xbf16>, vector<64x2xf32> -> vector<64x2xf32>
    %c0_5 = arith.constant 0 : index
    %c0_6 = arith.constant 0 : index
    %18 = vector.load %arg3[%c0_5, %c0_6] : memref<1x2xf32, #tpu.memory_space<vmem>>, vector<1x2xf32>
    %19 = vector.broadcast %18 : vector<1x2xf32> to vector<64x2xf32>
    %20 = arith.addf %17, %19 : vector<64x2xf32>
    %21 = tpu.transpose %20, [1, 0] : vector<64x2xf32> -> vector<2x64xf32>
    %c0_7 = arith.constant 0 : index
    %c0_8 = arith.constant 0 : index
    %c0_9 = arith.constant 0 : index
    %22 = vector.load %arg4[%c0_7, %c0_8, %c0_9] : memref<1x2x64xf32, #tpu.memory_space<vmem>>, vector<1x2x64xf32>
    %23 = vector.shape_cast %22 : vector<1x2x64xf32> to vector<2x64xf32>
    %24 = vector.shape_cast %21 : vector<2x64xf32> to vector<1x2x64xf32>
    tpu.vector_store %arg4[%c0_7, %c0_8, %c0_9], %24 {strides = array<i32>} : memref<1x2x64xf32, #tpu.memory_space<vmem>>, vector<1x2x64xf32>,
    return
  }
  func.func @transform_0(%arg0: i32) -> (i32, i32, i32) {
    %c0_i32 = arith.constant 0 : i32
    %c0_i32_0 = arith.constant 0 : i32
    %c0_i32_1 = arith.constant 0 : i32
    return %arg0, %c0_i32, %c0_i32_0 : i32, i32, i32
  }
  func.func @transform_1(%arg0: i32) -> (i32, i32) {
    %c0_i32 = arith.constant 0 : i32
    %c0_i32_0 = arith.constant 0 : i32
    %c0_i32_1 = arith.constant 0 : i32
    return %c0_i32, %c0_i32_0 : i32, i32
  }
  func.func @transform_2(%arg0: i32) -> (i32, i32) {
    %c0_i32 = arith.constant 0 : i32
    %c0_i32_0 = arith.constant 0 : i32
    %c0_i32_1 = arith.constant 0 : i32
    return %c0_i32, %c0_i32_0 : i32, i32
  }
  func.func @transform_3(%arg0: i32) -> (i32, i32, i32) {
    %c0_i32 = arith.constant 0 : i32
    %c0_i32_0 = arith.constant 0 : i32
    %c0_i32_1 = arith.constant 0 : i32
    return %arg0, %c0_i32, %c0_i32_0 : i32, i32, i32
  }
}

</mosaic_0001>

<bundles_post_ra>
// kernel: transition_layer_forward.1
= control target key start
LH: loop header
LB: loop body
LE: loop exit
PB: predicated region body
PF: predicated region fallthrough
CT: control target
= control target key end

     0   :  { %s1557_s12 = smov 0   ;;  %s1767_s0 = inlined_call_operand.vmem [shape: f32[2,4,256], index: 0, kind: input, shape index: {}]   ;;  %s1768_s1 = inlined_call_operand.vmem [shape: bf16[4,2], index: 1, kind: input, shape index: {}]   ;;  %s1769_s2 = inlined_call_operand.vmem [shape: f32[1,2], index: 2, kind: input, shape index: {}]   ;;  %s1770_s3 = inlined_call_operand.vmem [shape: f32[2,2,64], index: 3, kind: output, shape index: {}]  }
   0x1 LB: > { %s1418_s13 = sadd.s32 4294967295, %s1534_s12   ;;  %p1422_p0 = scmp.ge.s32.totalorder %s1534_s12, 1  ;;  %s1534_s12 = sphi %s1557_s12, %s13_s12  }
   0x2   : > { %p137_p1 = scmp.lt.s32.totalorder %s1534_s12, 3 }
   0x4   : > { %p138_p2 = pnand %p1422_p0, %p137_p1 }
   0x5   : > { %p160_p3 = scmp.lt.s32.totalorder (!%p138_p2), %s1418_s13, 1  ;;  %v990_v2 = vld [vmem:[%s1768_s1] sm:$0x3] (!%p138_p2)  ;;  %vm1262_vm0 = vcmask (!%p138_p2), 1041408   ;;  %v1536_v4 = vmov (!%p138_p2), 1983009808   ;;  %v274_v6 = vlaneseq (!%p138_p2) }
   0x6   : > { %141 = sbr.rel (%p138_p2) target bundleno = 628 (0x274), region = 32  ;;  %1515 = vmatprep.subr.msk.bf16.mxu0 (!%p138_p2), %vm1262_vm0, %v990_v2  ;;  %v1264_v3 = vsel (!%p138_p2), %vm1262_vm0, %v990_v2, 0  ;;  %1516 = vmatprep.subr.msk.bf16.mxu1 (!%p138_p2), %vm1262_vm0, %v990_v2  ;;  %v272_v5 = vunpack.c.l.s4 (!%p138_p2), %v1536_v4  ;;  %vm1127_vm1 = vcmask (!%p138_p2), 1041409   ;;  %vm1130_vm2 = vcmask (!%p138_p2), 1042434  }
   0x7   : > { %1504 = vmatpush3.bf16.msra.mxu0 (!%p138_p2), %v1264_v3  ;;  %1514 = vmatpush3.bf16.msra.mxu1 (!%p138_p2), %v1264_v3  ;;  %v275_v9 = vshrl.u32 (!%p138_p2), %v274_v6, 7  ;;  %vm1133_vm3 = vcmask (!%p138_p2), 1043459   ;;  %vm1136_vm4 = vcmask (!%p138_p2), 1044484   ;;  %vm1139_vm5 = vcmask (!%p138_p2), 1045509  }
   0x8   : > { %v273_v8 = vunpack.c.0.s8 (!%p138_p2), %v272_v5  ;;  %vm1142_vm6 = vcmask (!%p138_p2), 1046534   ;;  %vm1145_vm7 = vcmask (!%p138_p2), 1047559   ;;  %vm1249_vm8 = vcmask (!%p138_p2), 31744  }
   0x9   : > { %vm1363_vm9 = vcmask (!%p138_p2), 517120  }
   0xa   : > { %v1574_v11 = vsub.s32 (!%p138_p2), %v273_v8, %v275_v9 }
   0xd   : > { %s1772_s13 = smov (!%p160_p3, %s1418_s13), 1 }
   0xe   : > { %s1497_s14 = sshll.u32 %s1772_s13, 3  ;;  %s1425_s22 = sshll.u32 %s1772_s13, 1 }
   0xf   : > { %s164_s17 = scalar_lea.vmem %s1767_s0, %s1497_s14  ;;  %s168_s25 = scalar_lea.vmem %s1770_s3, %s1425_s22 }
  0x10   : > { %v170_v0 = vld [vmem:[%s164_s17] sm:$0xff] }
  0x11   : > { %174 = vxpose.xlu0.b32.start.end [1/1] (short) %v170_v0, 128  ;;  %v172_v1 = vcombine.high %v170_v0, %v170_v0 }
  0x4e   : > { %206 = vxpose.xlu0.b32.start.end [1/1] (short) %v172_v1, 128 }
  0x91   : > { %v190_v7 = vpop.trf.xlu0 }
  0x95   : > { %v191_v10 = vpop.trf.xlu0 }
  0x99   : > { %v192_v12 = vpop.trf.xlu0 }
  0x9a   : > { %v238_v13 = vadd.f32 %v192_v12, %v190_v7 }
  0x9c   : > { %v270_v14 = vcombine.high %v238_v13, %v238_v13  ;;  %v277_v15 = vrot.slane %v238_v13, %v1574_v11 }
  0x9d   : > { %v193_v16 = vpop.trf.xlu0 }
  0x9e   : > { %v284_v17 = vrot.slane %v270_v14, %v1574_v11  ;;  %v285_v18 = vcombine.high %v277_v15, %v277_v15  ;;  %v1426_v19 = vrot.slane %v277_v15, 9  ;;  %v239_v20 = vadd.f32 %v193_v16, %v191_v10 }
  0xa0   : > { %v286_v21 = vcombine.high %v284_v17, %v284_v17  ;;  %v1427_v22 = vrot.slane %v285_v18, 9  ;;  %v1428_v23 = vrot.slane %v284_v17, 9  ;;  %v798_v24 = vadd.f32 %v1426_v19, %v277_v15 }
  0xa1   : > { %v287_v25 = vcombine.high %v239_v20, %v239_v20  ;;  %v294_v26 = vrot.slane %v239_v20, %v1574_v11  ;;  %v194_v27 = vpop.trf.xlu0 }
  0xa2   : > { %v1429_v28 = vrot.slane %v286_v21, 9  ;;  %v799_v29 = vadd.f32 %v1427_v22, %v285_v18  ;;  %v800_v30 = vadd.f32 %v1428_v23, %v284_v17  ;;  %v862_v31 = vmul.f32 0.25, %v798_v24 }
  0xa3   : > { %v301_v32 = vrot.slane %v287_v25, %v1574_v11  ;;  %v302_v33 = vcombine.high %v294_v26, %v294_v26  ;;  %v1430_v34 = vrot.slane %v294_v26, 9 }
  0xa4   : > { %v801_v35 = vadd.f32 %v1429_v28, %v286_v21  ;;  %v863_v36 = vmul.f32 0.25, %v799_v29  ;;  %v864_v37 = vmul.f32 0.25, %v800_v30  ;;  %v926_v38 = vpack.c.bf16 %v862_v31, %v862_v31 }
  0xa5   : > { %v303_v39 = vcombine.high %v301_v32, %v301_v32  ;;  %v1431_v40 = vrot.slane %v302_v33, 9  ;;  %v1432_v41 = vrot.slane %v301_v32, 9  ;;  %v802_v42 = vadd.f32 %v1430_v34, %v294_v26  ;;  %v195_v43 = vpop.trf.xlu0 }
  0xa6   : > { %v865_v44 = vmul.f32 0.25, %v801_v35  ;;  %v927_v45 = vpack.c.bf16 %v863_v36, %v863_v36  ;;  %v928_v46 = vpack.c.bf16 %v864_v37, %v864_v37  ;;  %v1062_v52 = vunpack.c.l.b16 %v926_v38 }
  0xa7   : > { %v803_v47 = vadd.f32 %v1431_v40, %v302_v33  ;;  %v804_v48 = vadd.f32 %v1432_v41, %v301_v32  ;;  %v866_v49 = vmul.f32 0.25, %v802_v42  ;;  %v1433_v50 = vrot.slane %v303_v39, 9 }
  0xa8   : > { %v929_v51 = vpack.c.bf16 %v865_v44, %v865_v44  ;;  %v1063_v53 = vunpack.c.l.b16 %v927_v45  ;;  %v1064_v54 = vunpack.c.l.b16 %v928_v46 }
  0xa9   : > { %v867_v55 = vmul.f32 0.25, %v803_v47  ;;  %v868_v56 = vmul.f32 0.25, %v804_v48  ;;  %v930_v57 = vpack.c.bf16 %v866_v49, %v866_v49  ;;  %v196_v58 = vpop.trf.xlu0  ;;  %v805_v59 = vadd.f32 %v1433_v50, %v303_v39 }
  0xaa   : > { %v1065_v60 = vunpack.c.l.b16 %v929_v51  ;;  %v1126_v61 = vrot.slane %v1063_v53, 7  ;;  %v1129_v62 = vrot.slane %v1064_v54, 6  ;;  %v240_v63 = vadd.f32 %v196_v58, %v194_v27 }
  0xab   : > { %v931_v0 = vpack.c.bf16 %v867_v55, %v867_v55  ;;  %v932_v1 = vpack.c.bf16 %v868_v56, %v868_v56  ;;  %v1066_v2 = vunpack.c.l.b16 %v930_v57  ;;  %v869_v3 = vmul.f32 0.25, %v805_v59 }
  0xac   : > { %v1128_v4 = vsel %vm1127_vm1, %v1126_v61, %v1062_v52  ;;  %v1132_v5 = vrot.slane %v1065_v60, 5  ;;  %v304_v6 = vcombine.high %v240_v63, %v240_v63  ;;  %v311_v7 = vrot.slane %v240_v63, %v1574_v11 }
  0xad   : > { %v1067_v8 = vunpack.c.l.b16 %v931_v0  ;;  %v1135_v9 = vrot.slane %v1066_v2, 4  ;;  %v197_v10 = vpop.trf.xlu0  ;;  %v933_v12 = vpack.c.bf16 %v869_v3, %v869_v3  ;;  %v1582_v13 = vunpack.c.l.b16 %v932_v1 }
  0xae   : > { %v318_v14 = vrot.slane %v304_v6, %v1574_v11  ;;  %v319_v15 = vcombine.high %v311_v7, %v311_v7  ;;  %v1434_v16 = vrot.slane %v311_v7, 9  ;;  %v241_v17 = vadd.f32 %v197_v10, %v195_v43 }
  0xaf   : > { %v1138_v18 = vrot.slane %v1067_v8, 3  ;;  %v1585_v19 = vunpack.c.l.b16 %v933_v12  ;;  %v1131_v20 = vsel %vm1130_vm2, %v1129_v62, %v1128_v4  ;;  %v1141_v21 = vrot.slane %v1582_v13, 2 }
  0xb0   : > { %v320_v22 = vcombine.high %v318_v14, %v318_v14  ;;  %v1435_v23 = vrot.slane %v319_v15, 9  ;;  %v1436_v24 = vrot.slane %v318_v14, 9  ;;  %v806_v25 = vadd.f32 %v1434_v16, %v311_v7 }
  0xb1   : > { %v321_v26 = vcombine.high %v241_v17, %v241_v17  ;;  %v328_v27 = vrot.slane %v241_v17, %v1574_v11  ;;  %v198_v28 = vpop.trf.xlu0  ;;  %v1134_v29 = vsel %vm1133_vm3, %v1132_v5, %v1131_v20  ;;  %v1144_v30 = vrot.slane %v1585_v19, 1 }
  0xb2   : > { %v1437_v31 = vrot.slane %v320_v22, 9  ;;  %v807_v32 = vadd.f32 %v1435_v23, %v319_v15  ;;  %v808_v33 = vadd.f32 %v1436_v24, %v318_v14  ;;  %v870_v34 = vmul.f32 0.25, %v806_v25 }
  0xb3   : > { %v335_v35 = vrot.slane %v321_v26, %v1574_v11  ;;  %v336_v36 = vcombine.high %v328_v27, %v328_v27  ;;  %v1438_v37 = vrot.slane %v328_v27, 9  ;;  %v1137_v38 = vsel %vm1136_vm4, %v1135_v9, %v1134_v29 }
  0xb4   : > { %v809_v39 = vadd.f32 %v1437_v31, %v320_v22  ;;  %v871_v40 = vmul.f32 0.25, %v807_v32  ;;  %v872_v41 = vmul.f32 0.25, %v808_v33  ;;  %v934_v42 = vpack.c.bf16 %v870_v34, %v870_v34 }
  0xb5   : > { %v337_v43 = vcombine.high %v335_v35, %v335_v35  ;;  %v1439_v44 = vrot.slane %v336_v36, 9  ;;  %v1440_v45 = vrot.slane %v335_v35, 9  ;;  %v810_v46 = vadd.f32 %v1438_v37, %v328_v27  ;;  %v199_v47 = vpop.trf.xlu0 }
  0xb6   : > { %v873_v48 = vmul.f32 0.25, %v809_v39  ;;  %v935_v49 = vpack.c.bf16 %v871_v40, %v871_v40  ;;  %v936_v50 = vpack.c.bf16 %v872_v41, %v872_v41  ;;  %v1070_v51 = vunpack.c.l.b16 %v934_v42 }
  0xb7   : > { %v811_v52 = vadd.f32 %v1439_v44, %v336_v36  ;;  %v812_v53 = vadd.f32 %v1440_v45, %v335_v35  ;;  %v874_v54 = vmul.f32 0.25, %v810_v46  ;;  %v1441_v55 = vrot.slane %v337_v43, 9 }
  0xb8   : > { %v937_v56 = vpack.c.bf16 %v873_v48, %v873_v48  ;;  %v1071_v57 = vunpack.c.l.b16 %v935_v49  ;;  %v1072_v58 = vunpack.c.l.b16 %v936_v50  ;;  %v1140_v59 = vsel %vm1139_vm5, %v1138_v18, %v1137_v38 }
  0xb9   : > { %v875_v60 = vmul.f32 0.25, %v811_v52  ;;  %v876_v61 = vmul.f32 0.25, %v812_v53  ;;  %v938_v62 = vpack.c.bf16 %v874_v54, %v874_v54  ;;  %v200_v63 = vpop.trf.xlu0  ;;  %v813_v0 = vadd.f32 %v1441_v55, %v337_v43 }
  0xba   : > { %v1073_v1 = vunpack.c.l.b16 %v937_v56  ;;  %v1147_v2 = vrot.slane %v1071_v57, 7  ;;  %v1149_v3 = vrot.slane %v1072_v58, 6  ;;  %v242_v4 = vadd.f32 %v200_v63, %v198_v28 }
  0xbb   : > { %v939_v5 = vpack.c.bf16 %v875_v60, %v875_v60  ;;  %v940_v6 = vpack.c.bf16 %v876_v61, %v876_v61  ;;  %v1074_v7 = vunpack.c.l.b16 %v938_v62  ;;  %v877_v8 = vmul.f32 0.25, %v813_v0 }
  0xbc   : > { %v1148_v9 = vsel %vm1127_vm1, %v1147_v2, %v1070_v51  ;;  %v1151_v10 = vrot.slane %v1073_v1, 5  ;;  %v338_v12 = vcombine.high %v242_v4, %v242_v4  ;;  %v345_v14 = vrot.slane %v242_v4, %v1574_v11 }
  0xbd   : > { %v1075_v15 = vunpack.c.l.b16 %v939_v5  ;;  %v1153_v16 = vrot.slane %v1074_v7, 4  ;;  %v201_v17 = vpop.trf.xlu0  ;;  %v941_v18 = vpack.c.bf16 %v877_v8, %v877_v8  ;;  %v1597_v20 = vunpack.c.l.b16 %v940_v6 }
  0xbe   : > { %v352_v22 = vrot.slane %v338_v12, %v1574_v11  ;;  %v353_v23 = vcombine.high %v345_v14, %v345_v14  ;;  %v1442_v24 = vrot.slane %v345_v14, 9  ;;  %v243_v25 = vadd.f32 %v201_v17, %v199_v47 }
  0xbf   : > { %v1155_v26 = vrot.slane %v1075_v15, 3  ;;  %v1600_v27 = vunpack.c.l.b16 %v941_v18  ;;  %v1143_v28 = vsel %vm1142_vm6, %v1141_v21, %v1140_v59  ;;  %v1150_v29 = vsel %vm1130_vm2, %v1149_v3, %v1148_v9 }
  0xc0   : > { %v354_v31 = vcombine.high %v352_v22, %v352_v22  ;;  %v1443_v32 = vrot.slane %v353_v23, 9  ;;  %v1444_v33 = vrot.slane %v352_v22, 9  ;;  %v814_v34 = vadd.f32 %v1442_v24, %v345_v14 }
  0xc1   : > { %v355_v35 = vcombine.high %v243_v25, %v243_v25  ;;  %v362_v36 = vrot.slane %v243_v25, %v1574_v11  ;;  %v202_v37 = vpop.trf.xlu0  ;;  %v1610_v38 = vsel %vm1145_vm7, %v1144_v30, %v1143_v28  ;;  %v1152_v39 = vsel %vm1133_vm3, %v1151_v10, %v1150_v29 }
  0xc2   : > { %v1445_v13 = vrot.slane %v354_v31, 9  ;;  %v815_v40 = vadd.f32 %v1443_v32, %v353_v23  ;;  %v816_v21 = vadd.f32 %v1444_v33, %v352_v22  ;;  %v878_v41 = vmul.f32 0.25, %v814_v34 }
  0xc3   : > { %v369_v42 = vrot.slane %v355_v35, %v1574_v11  ;;  %v370_v43 = vcombine.high %v362_v36, %v362_v36  ;;  %v1446_v44 = vrot.slane %v362_v36, 9  ;;  %v1154_v45 = vsel %vm1136_vm4, %v1153_v16, %v1152_v39 }
  0xc4   : > { %v817_v46 = vadd.f32 %v1445_v13, %v354_v31  ;;  %v879_v47 = vmul.f32 0.25, %v815_v40  ;;  %v880_v48 = vmul.f32 0.25, %v816_v21  ;;  %v942_v49 = vpack.c.bf16 %v878_v41, %v878_v41 }
  0xc5   : > { %v371_v19 = vcombine.high %v369_v42, %v369_v42  ;;  %v1447_v50 = vrot.slane %v370_v43, 9  ;;  %v1448_v30 = vrot.slane %v369_v42, 9  ;;  %v818_v51 = vadd.f32 %v1446_v44, %v362_v36  ;;  %v203_v52 = vpop.trf.xlu0 }
  0xc6   : > { %v881_v53 = vmul.f32 0.25, %v817_v46  ;;  %v943_v54 = vpack.c.bf16 %v879_v47, %v879_v47  ;;  %v944_v55 = vpack.c.bf16 %v880_v48, %v880_v48  ;;  %v1078_v56 = vunpack.c.l.b16 %v942_v49 }
  0xc7   : > { %v1449_v57 = vrot.slane %v371_v19, 9  ;;  %v819_v58 = vadd.f32 %v1447_v50, %v370_v43  ;;  %v820_v59 = vadd.f32 %v1448_v30, %v369_v42  ;;  %v882_v60 = vmul.f32 0.25, %v818_v51 }
  0xc8   : > { %v945_v61 = vpack.c.bf16 %v881_v53, %v881_v53  ;;  %v1079_v62 = vunpack.c.l.b16 %v943_v54  ;;  %v1080_v63 = vunpack.c.l.b16 %v944_v55  ;;  %v1156_v0 = vsel %vm1139_vm5, %v1155_v26, %v1154_v45 }
  0xc9   : > { %v821_v1 = vadd.f32 %v1449_v57, %v371_v19  ;;  %v883_v2 = vmul.f32 0.25, %v819_v58  ;;  %v884_v3 = vmul.f32 0.25, %v820_v59  ;;  %v946_v4 = vpack.c.bf16 %v882_v60, %v882_v60  ;;  %v204_v5 = vpop.trf.xlu0 }
  0xca   : > { %v1081_v6 = vunpack.c.l.b16 %v945_v61  ;;  %v1161_v7 = vrot.slane %v1079_v62, 7  ;;  %v1163_v8 = vrot.slane %v1080_v63, 6  ;;  %v1157_v9 = vrot.slane %v1597_v20, 2 }
  0xcb   : > { %v885_v10 = vmul.f32 0.25, %v821_v1  ;;  %v947_v12 = vpack.c.bf16 %v883_v2, %v883_v2  ;;  %v948_v14 = vpack.c.bf16 %v884_v3, %v884_v3  ;;  %v1082_v15 = vunpack.c.l.b16 %v946_v4 }
  0xcc   : > { %v1162_v16 = vsel %vm1127_vm1, %v1161_v7, %v1078_v56  ;;  %v1165_v17 = vrot.slane %v1081_v6, 5  ;;  %v1158_v18 = vsel %vm1142_vm6, %v1157_v9, %v1156_v0  ;;  %v1159_v22 = vrot.slane %v1600_v27, 1 }
  0xcd   : > { %v1164_v23 = vsel %vm1130_vm2, %v1163_v8, %v1162_v16  ;;  %v949_v24 = vpack.c.bf16 %v885_v10, %v885_v10  ;;  %v1083_v25 = vunpack.c.l.b16 %v947_v12  ;;  %v1084_v26 = vunpack.c.l.b16 %v948_v14  ;;  %v205_v28 = vpop.trf.xlu0 }
  0xce   : > { %v1166_v29 = vsel %vm1133_vm3, %v1165_v17, %v1164_v23  ;;  %v1167_v20 = vrot.slane %v1082_v15, 4  ;;  %v1160_v31 = vsel %vm1145_vm7, %v1159_v22, %v1158_v18  ;;  %v244_v32 = vadd.f32 %v204_v5, %v202_v37 }
  0xcf   : > { %v1085_v33 = vunpack.c.l.b16 %v949_v24  ;;  %v1169_v34 = vrot.slane %v1083_v25, 3  ;;  %v1171_v35 = vrot.slane %v1084_v26, 2  ;;  %v1245_v36 = vpack.c.b16 %v1160_v31, %v1610_v38 }
  0xd0   : > { %v1168_v39 = vsel %vm1136_vm4, %v1167_v20, %v1166_v29  ;;  %v372_v27 = vcombine.high %v244_v32, %v244_v32  ;;  %v379_v13 = vrot.slane %v244_v32, %v1574_v11  ;;  %v245_v40 = vadd.f32 %v205_v28, %v203_v52 }
  0xd1   : > { %1505 = vmatprep.mubr.msk.bf16.mxu0 %vm1249_vm8, %v1245_v36  ;;  %v222_v21 = vpop.trf.xlu0  ;;  %v1170_v41 = vsel %vm1139_vm5, %v1169_v34, %v1168_v39  ;;  %v1173_v42 = vrot.slane %v1085_v33, 1 }
  0xd2   : > { %v386_v43 = vrot.slane %v372_v27, %v1574_v11  ;;  %v387_v37 = vcombine.high %v379_v13, %v379_v13  ;;  %v1450_v44 = vrot.slane %v379_v13, 9  ;;  %v389_v45 = vcombine.high %v245_v40, %v245_v40 }
  0xd3   : > { %v396_v46 = vrot.slane %v245_v40, %v1574_v11  ;;  %v1172_v38 = vsel %vm1142_vm6, %v1171_v35, %v1170_v41 }
  0xd4   : > { %v388_v47 = vcombine.high %v386_v43, %v386_v43  ;;  %v1451_v48 = vrot.slane %v387_v37, 9  ;;  %v1452_v49 = vrot.slane %v386_v43, 9  ;;  %v822_v19 = vadd.f32 %v1450_v44, %v379_v13 }
  0xd5   : > { %v403_v50 = vrot.slane %v389_v45, %v1574_v11  ;;  %v404_v30 = vcombine.high %v396_v46, %v396_v46  ;;  %v1454_v51 = vrot.slane %v396_v46, 9  ;;  %v223_v52 = vpop.trf.xlu0  ;;  %v1633_v53 = vsel %vm1145_vm7, %v1173_v42, %v1172_v38 }
  0xd6   : > { %v1453_v54 = vrot.slane %v388_v47, 9  ;;  %v823_v55 = vadd.f32 %v1451_v48, %v387_v37  ;;  %v824_v56 = vadd.f32 %v1452_v49, %v386_v43  ;;  %v886_v57 = vmul.f32 0.25, %v822_v19 }
  0xd7   : > { %v405_v58 = vcombine.high %v403_v50, %v403_v50  ;;  %v1455_v59 = vrot.slane %v404_v30, 9  ;;  %v1456_v60 = vrot.slane %v403_v50, 9  ;;  %v826_v61 = vadd.f32 %v1454_v51, %v396_v46 }
  0xd8   : > { %v825_v62 = vadd.f32 %v1453_v54, %v388_v47  ;;  %v887_v63 = vmul.f32 0.25, %v823_v55  ;;  %v888_v0 = vmul.f32 0.25, %v824_v56  ;;  %v950_v1 = vpack.c.bf16 %v886_v57, %v886_v57 }
  0xd9   : > { %v1457_v2 = vrot.slane %v405_v58, 9  ;;  %v827_v3 = vadd.f32 %v1455_v59, %v404_v30  ;;  %v828_v4 = vadd.f32 %v1456_v60, %v403_v50  ;;  %v890_v5 = vmul.f32 0.25, %v826_v61  ;;  %v224_v6 = vpop.trf.xlu0 }
  0xda   : > { %v889_v7 = vmul.f32 0.25, %v825_v62  ;;  %v951_v8 = vpack.c.bf16 %v887_v63, %v887_v63  ;;  %v952_v9 = vpack.c.bf16 %v888_v0, %v888_v0  ;;  %v1086_v10 = vunpack.c.l.b16 %v950_v1 }
  0xdb   : > { %v829_v12 = vadd.f32 %v1457_v2, %v405_v58  ;;  %v891_v14 = vmul.f32 0.25, %v827_v3  ;;  %v892_v15 = vmul.f32 0.25, %v828_v4  ;;  %v954_v16 = vpack.c.bf16 %v890_v5, %v890_v5 }
  0xdc   : > { %v953_v17 = vpack.c.bf16 %v889_v7, %v889_v7  ;;  %v1087_v18 = vunpack.c.l.b16 %v951_v8  ;;  %v1088_v22 = vunpack.c.l.b16 %v952_v9  ;;  %v246_v23 = vadd.f32 %v224_v6, %v222_v21 }
  0xdd   : > { %v893_v24 = vmul.f32 0.25, %v829_v12  ;;  %v955_v25 = vpack.c.bf16 %v891_v14, %v891_v14  ;;  %v956_v26 = vpack.c.bf16 %v892_v15, %v892_v15  ;;  %v1090_v28 = vunpack.c.l.b16 %v954_v16  ;;  %v225_v29 = vpop.trf.xlu0 }
  0xde   : > { %v1089_v20 = vunpack.c.l.b16 %v953_v17  ;;  %v1175_v31 = vrot.slane %v1087_v18, 7  ;;  %v1177_v32 = vrot.slane %v1088_v22, 6  ;;  %v406_v33 = vcombine.high %v246_v23, %v246_v23 }
  0xdf   : > { %v957_v34 = vpack.c.bf16 %v893_v24, %v893_v24  ;;  %v1091_v35 = vunpack.c.l.b16 %v955_v25  ;;  %v1092_v36 = vunpack.c.l.b16 %v956_v26  ;;  %v1181_v39 = vrot.slane %v1090_v28, 4 }
  0xe0   : > { %v1176_v27 = vsel %vm1127_vm1, %v1175_v31, %v1086_v10  ;;  %v1179_v13 = vrot.slane %v1089_v20, 5  ;;  %v413_v40 = vrot.slane %v246_v23, %v1574_v11  ;;  %v420_v21 = vrot.slane %v406_v33, %v1574_v11 }
  0xe1   : > { %v1178_v41 = vsel %vm1130_vm2, %v1177_v32, %v1176_v27  ;;  %v1093_v42 = vunpack.c.l.b16 %v957_v34  ;;  %v1183_v43 = vrot.slane %v1091_v35, 3  ;;  %v1185_v37 = vrot.slane %v1092_v36, 2  ;;  %v226_v44 = vpop.trf.xlu0 }
  0xe2   : > { %v1180_v45 = vsel %vm1133_vm3, %v1179_v13, %v1178_v41  ;;  %v421_v46 = vcombine.high %v413_v40, %v413_v40  ;;  %v422_v38 = vcombine.high %v420_v21, %v420_v21  ;;  %v1458_v47 = vrot.slane %v413_v40, 9 }
  0xe3   : > { %v1182_v48 = vsel %vm1136_vm4, %v1181_v39, %v1180_v45  ;;  %v1460_v49 = vrot.slane %v420_v21, 9  ;;  %v247_v19 = vadd.f32 %v225_v29, %v223_v52  ;;  %v1187_v50 = vrot.slane %v1093_v42, 1 }
  0xe4   : > { %v1459_v30 = vrot.slane %v421_v46, 9  ;;  %v1461_v51 = vrot.slane %v422_v38, 9  ;;  %v830_v54 = vadd.f32 %v1458_v47, %v413_v40  ;;  %v1184_v55 = vsel %vm1139_vm5, %v1183_v43, %v1182_v48 }
  0xe5   : > { %v832_v56 = vadd.f32 %v1460_v49, %v420_v21  ;;  %v423_v57 = vcombine.high %v247_v19, %v247_v19  ;;  %v430_v58 = vrot.slane %v247_v19, %v1574_v11  ;;  %v1186_v59 = vsel %vm1142_vm6, %v1185_v37, %v1184_v55  ;;  %v227_v60 = vpop.trf.xlu0 }
  0xe6   : > { %v831_v61 = vadd.f32 %v1459_v30, %v421_v46  ;;  %v833_v62 = vadd.f32 %v1461_v51, %v422_v38  ;;  %v894_v63 = vmul.f32 0.25, %v830_v54  ;;  %v1188_v0 = vsel %vm1145_vm7, %v1187_v50, %v1186_v59 }
  0xe7   : > { %v896_v1 = vmul.f32 0.25, %v832_v56  ;;  %v437_v52 = vrot.slane %v423_v57, %v1574_v11  ;;  %v438_v2 = vcombine.high %v430_v58, %v430_v58  ;;  %v1462_v3 = vrot.slane %v430_v58, 9 }
  0xe8   : > { %v895_v4 = vmul.f32 0.25, %v831_v61  ;;  %v897_v5 = vmul.f32 0.25, %v833_v62  ;;  %v1246_v6 = vpack.c.b16 %v1188_v0, %v1633_v53  ;;  %v958_v10 = vpack.c.bf16 %v894_v63, %v894_v63 }
  0xe9   : > { %v1463_v7 = vrot.slane %v438_v2, 9  ;;  %v1464_v8 = vrot.slane %v437_v52, 9  ;;  %v228_v9 = vpop.trf.xlu0  ;;  %v834_v12 = vadd.f32 %v1462_v3, %v430_v58  ;;  %v960_v15 = vpack.c.bf16 %v896_v1, %v896_v1 }
  0xea   : > { %1506 = vmatmul.mubr.msk.bf16.vlgmr.msra.gmra.mrb[0].mxu0 %vm1249_vm8, %v1246_v6  ;;  %v959_v14 = vpack.c.bf16 %v895_v4, %v895_v4  ;;  %v248_v16 = vadd.f32 %v228_v9, %v226_v44  ;;  %v961_v17 = vpack.c.bf16 %v897_v5, %v897_v5  ;;  %v1094_v25 = vunpack.c.l.b16 %v958_v10 }
  0xeb   : > { %v835_v18 = vadd.f32 %v1463_v7, %v438_v2  ;;  %v836_v22 = vadd.f32 %v1464_v8, %v437_v52  ;;  %v1648_v26 = vcombine.high %v437_v52, %v437_v52  ;;  %v898_v28 = vmul.f32 0.25, %v834_v12 }
  0xec   : > { %v440_v23 = vcombine.high %v248_v16, %v248_v16  ;;  %v447_v53 = vrot.slane %v248_v16, %v1574_v11  ;;  %v1095_v29 = vunpack.c.l.b16 %v959_v14  ;;  %v1651_v20 = vunpack.c.l.b16 %v960_v15 }
  0xed   : > { %v229_v24 = vpop.trf.xlu0  ;;  %v1654_v33 = vunpack.c.l.b16 %v961_v17  ;;  %v899_v34 = vmul.f32 0.25, %v835_v18  ;;  %v1656_v39 = vmul.f32 0.25, %v836_v22  ;;  %v962_v41 = vpack.c.bf16 %v898_v28, %v898_v28 }
  0xee   : > { %v454_v31 = vrot.slane %v440_v23, %v1574_v11  ;;  %v249_v32 = vadd.f32 %v229_v24, %v227_v60  ;;  %v455_v35 = vcombine.high %v447_v53, %v447_v53  ;;  %v1466_v36 = vrot.slane %v447_v53, 9 }
  0xef   : > { %v1189_v44 = vrot.slane %v1095_v29, 7  ;;  %v963_v47 = vpack.c.bf16 %v899_v34, %v899_v34  ;;  %v1660_v56 = vunpack.c.l.b16 %v962_v41  ;;  %v1465_v2 = vrot.slane %v1648_v26, 9 }
  0xf0   : > { %v456_v27 = vcombine.high %v454_v31, %v454_v31  ;;  %v1468_v13 = vrot.slane %v454_v31, 9  ;;  %v457_v40 = vcombine.high %v249_v32, %v249_v32  ;;  %v1467_v42 = vrot.slane %v455_v35, 9 }
  0xf1   : > { %v230_v21 = vpop.trf.xlu0  ;;  %v838_v43 = vadd.f32 %v1466_v36, %v447_v53  ;;  %v464_v37 = vrot.slane %v249_v32, %v1574_v11  ;;  %v1662_v0 = vunpack.c.l.b16 %v963_v47  ;;  %v1191_v3 = vrot.slane %v1651_v20, 6 }
  0xf2   : > { %v1469_v45 = vrot.slane %v456_v27, 9  ;;  %v840_v46 = vadd.f32 %v1468_v13, %v454_v31  ;;  %v471_v38 = vrot.slane %v457_v40, %v1574_v11  ;;  %v839_v48 = vadd.f32 %v1467_v42, %v455_v35 }
  0xf3   : > { %v472_v49 = vcombine.high %v464_v37, %v464_v37  ;;  %v1470_v19 = vrot.slane %v464_v37, 9  ;;  %v902_v30 = vmul.f32 0.25, %v838_v43  ;;  %v1193_v4 = vrot.slane %v1654_v33, 5 }
  0xf4   : > { %v841_v50 = vadd.f32 %v1469_v45, %v456_v27  ;;  %v904_v51 = vmul.f32 0.25, %v840_v46  ;;  %v1472_v54 = vrot.slane %v471_v38, 9  ;;  %v903_v57 = vmul.f32 0.25, %v839_v48 }
  0xf5   : > { %v231_v55 = vpop.trf.xlu0  ;;  %v1471_v58 = vrot.slane %v472_v49, 9  ;;  %v842_v59 = vadd.f32 %v1470_v19, %v464_v37  ;;  %v473_v62 = vcombine.high %v471_v38, %v471_v38  ;;  %v966_v5 = vpack.c.bf16 %v902_v30, %v902_v30 }
  0xf6   : > { %v905_v60 = vmul.f32 0.25, %v841_v50  ;;  %v968_v61 = vpack.c.bf16 %v904_v51, %v904_v51  ;;  %v844_v63 = vadd.f32 %v1472_v54, %v471_v38  ;;  %v967_v1 = vpack.c.bf16 %v903_v57, %v903_v57 }
  0xf7   : > { %v843_v52 = vadd.f32 %v1471_v58, %v472_v49  ;;  %v906_v6 = vmul.f32 0.25, %v842_v59  ;;  %v1672_v14 = vsel %vm1127_vm1, %v1189_v44, %v1094_v25  ;;  %v964_v15 = vpack.c.bf16 %v1656_v39, %v1656_v39 }
  0xf8   : > { %v969_v8 = vpack.c.bf16 %v905_v60, %v905_v60  ;;  %v1667_v9 = vunpack.c.l.b16 %v968_v61  ;;  %v1669_v10 = vmul.f32 0.25, %v844_v63  ;;  %v1195_v16 = vrot.slane %v1660_v56, 4 }
  0xf9   : > { %v232_v7 = vpop.trf.xlu0  ;;  %v1473_v17 = vrot.slane %v473_v62, 9  ;;  %v1197_v18 = vrot.slane %v1662_v0, 3  ;;  %v1103_v22 = vunpack.c.l.b16 %v967_v1  ;;  %v907_v23 = vmul.f32 0.25, %v843_v52 }
  0xfa   : > { %v250_v12 = vadd.f32 %v232_v7, %v230_v21  ;;  %v1102_v28 = vunpack.c.l.b16 %v966_v5  ;;  %v970_v53 = vpack.c.bf16 %v906_v6, %v906_v6  ;;  %v837_v32 = vadd.f32 %v1465_v2, %v1648_v26 }
  0xfb   : > { %v1680_v25 = vunpack.c.l.b16 %v969_v8  ;;  %v1205_v34 = vrot.slane %v1667_v9, 6  ;;  %v972_v35 = vpack.c.bf16 %v1669_v10, %v1669_v10  ;;  %v845_v21 = vadd.f32 %v1473_v17, %v473_v62 }
  0xfc   : > { %v474_v24 = vcombine.high %v250_v12, %v250_v12  ;;  %v481_v29 = vrot.slane %v250_v12, %v1574_v11  ;;  %v1203_v41 = vrot.slane %v1103_v22, 7  ;;  %v971_v42 = vpack.c.bf16 %v907_v23, %v907_v23 }
  0xfd   : > { %v233_v31 = vpop.trf.xlu0  ;;  %v1207_v47 = vrot.slane %v1680_v25, 5  ;;  %v1690_v48 = vunpack.c.l.b16 %v970_v53  ;;  %v901_v54 = vmul.f32 0.25, %v837_v32  ;;  %v909_v59 = vmul.f32 0.25, %v845_v21 }
  0xfe   : > { %v488_v36 = vrot.slane %v474_v24, %v1574_v11  ;;  %v489_v27 = vcombine.high %v481_v29, %v481_v29  ;;  %v1474_v13 = vrot.slane %v481_v29, 9  ;;  %v251_v40 = vadd.f32 %v233_v31, %v231_v55 }
  0xff   : > { %v1204_v7 = vsel %vm1127_vm1, %v1203_v41, %v1102_v28  ;;  %v1107_v17 = vunpack.c.l.b16 %v971_v42  ;;  %v965_v31 = vpack.c.bf16 %v901_v54, %v901_v54  ;;  %v973_v32 = vpack.c.bf16 %v909_v59, %v909_v59 }
 0x100   : > { %v490_v43 = vcombine.high %v488_v36, %v488_v36  ;;  %v1476_v37 = vrot.slane %v488_v36, 9  ;;  %v1475_v44 = vrot.slane %v489_v27, 9  ;;  %v846_v45 = vadd.f32 %v1474_v13, %v481_v29 }
 0x101   : > { %v491_v26 = vcombine.high %v251_v40, %v251_v40  ;;  %v498_v46 = vrot.slane %v251_v40, %v1574_v11  ;;  %v1687_v38 = vpop.trf.xlu0  ;;  %v1100_v28 = vunpack.c.l.b16 %v964_v15  ;;  %v1192_v41 = vsel %vm1130_vm2, %v1191_v3, %v1672_v14 }
 0x102   : > { %v1477_v49 = vrot.slane %v490_v43, 9  ;;  %v848_v19 = vadd.f32 %v1476_v37, %v488_v36  ;;  %v847_v50 = vadd.f32 %v1475_v44, %v489_v27  ;;  %v910_v60 = vmul.f32 0.25, %v846_v45 }
 0x103   : > { %v505_v30 = vrot.slane %v491_v26, %v1574_v11  ;;  %v506_v51 = vcombine.high %v498_v46, %v498_v46  ;;  %v1478_v58 = vrot.slane %v498_v46, 9  ;;  %v1209_v27 = vrot.slane %v1690_v48, 4 }
 0x104   : > { %v849_v55 = vadd.f32 %v1477_v49, %v490_v43  ;;  %v912_v57 = vmul.f32 0.25, %v848_v19  ;;  %v911_v61 = vmul.f32 0.25, %v847_v50  ;;  %v974_v13 = vpack.c.bf16 %v910_v60, %v910_v60 }
 0x105   : > { %v507_v62 = vcombine.high %v505_v30, %v505_v30  ;;  %v1479_v63 = vrot.slane %v506_v51, 9  ;;  %v235_v1 = vpop.trf.xlu0  ;;  %v1480_v5 = vrot.slane %v505_v30, 9  ;;  %v850_v6 = vadd.f32 %v1478_v58, %v498_v46 }
 0x106   : > { %v913_v52 = vmul.f32 0.25, %v849_v55  ;;  %v976_v2 = vpack.c.bf16 %v912_v57, %v912_v57  ;;  %v975_v8 = vpack.c.bf16 %v911_v61, %v911_v61  ;;  %v1194_v26 = vsel %vm1133_vm3, %v1193_v4, %v1192_v41 }
 0x107   : > { %v1481_v10 = vrot.slane %v507_v62, 9  ;;  %v851_v12 = vadd.f32 %v1479_v63, %v506_v51  ;;  %v852_v23 = vadd.f32 %v1480_v5, %v505_v30  ;;  %v914_v24 = vmul.f32 0.25, %v850_v6 }
 0x108   : > { %v977_v22 = vpack.c.bf16 %v913_v52, %v913_v52  ;;  %v1111_v53 = vunpack.c.l.b16 %v975_v8  ;;  %v1112_v40 = vunpack.c.l.b16 %v976_v2  ;;  %v1101_v46 = vunpack.c.l.b16 %v965_v31 }
 0x109   : > { %v853_v29 = vadd.f32 %v1481_v10, %v507_v62  ;;  %v236_v36 = vpop.trf.xlu0  ;;  %v915_v21 = vmul.f32 0.25, %v851_v12  ;;  %v916_v37 = vmul.f32 0.25, %v852_v23  ;;  %v978_v45 = vpack.c.bf16 %v914_v24, %v914_v24 }
 0x10a   : > { %v1113_v43 = vunpack.c.l.b16 %v977_v22  ;;  %v1217_v42 = vrot.slane %v1111_v53, 7  ;;  %v1108_v48 = vunpack.c.l.b16 %v972_v35  ;;  %v1109_v49 = vunpack.c.l.b16 %v973_v32 }
 0x10b   : > { %v1702_v44 = vmul.f32 0.25, %v853_v29  ;;  %v1196_v39 = vsel %vm1136_vm4, %v1195_v16, %v1194_v26  ;;  %v1211_v15 = vrot.slane %v1107_v17, 3  ;;  %v1110_v19 = vunpack.c.l.b16 %v974_v13 }
 0x10c   : > { %v1219_v20 = vrot.slane %v1112_v40, 6  ;;  %v979_v50 = vpack.c.bf16 %v915_v21, %v915_v21  ;;  %v1221_v3 = vrot.slane %v1113_v43, 5  ;;  %v980_v14 = vpack.c.bf16 %v916_v37, %v916_v37 }
 0x10d   : > { %v1198_v30 = vsel %vm1139_vm5, %v1197_v18, %v1196_v39  ;;  %v1199_v33 = vrot.slane %v1100_v28, 2  ;;  %v237_v51 = vpop.trf.xlu0  ;;  %v1218_v4 = vsel %vm1127_vm1, %v1217_v42, %v1110_v19  ;;  %v981_v35 = vpack.c.bf16 %v1702_v44, %v1702_v44 }
 0x10e   : > { %v1716_v56 = vunpack.c.l.b16 %v978_v45  ;;  %v1206_v16 = vsel %vm1130_vm2, %v1205_v34, %v1204_v7  ;;  %v1201_v54 = vrot.slane %v1101_v46, 1  ;;  %v1213_v55 = vrot.slane %v1108_v48, 2 }
 0x10f   : > { %v1208_v0 = vsel %vm1133_vm3, %v1207_v47, %v1206_v16  ;;  %v1215_v18 = vrot.slane %v1109_v49, 1  ;;  %v1200_v57 = vsel %vm1142_vm6, %v1199_v33, %v1198_v30  ;;  %v252_v59 = vadd.f32 %v236_v36, %v1687_v38 }
 0x110   : > { %v1210_v58 = vsel %vm1136_vm4, %v1209_v27, %v1208_v0  ;;  %v253_v60 = vadd.f32 %v237_v51, %v235_v1  ;;  %v1220_v61 = vsel %vm1130_vm2, %v1219_v20, %v1218_v4  ;;  %v1728_v62 = vunpack.c.l.b16 %v979_v50 }
 0x111   : > { %v1730_v9 = vunpack.c.l.b16 %v980_v14  ;;  %v1212_v34 = vsel %vm1139_vm5, %v1211_v15, %v1210_v58  ;;  %v508_v47 = vcombine.high %v252_v59, %v252_v59  ;;  %v515_v63 = vrot.slane %v252_v59, %v1574_v11 }
 0x112   : > { %v1214_v25 = vsel %vm1142_vm6, %v1213_v55, %v1212_v34  ;;  %v525_v52 = vcombine.high %v253_v60, %v253_v60  ;;  %v1223_v2 = vrot.slane %v1716_v56, 4  ;;  %v1202_v5 = vsel %vm1145_vm7, %v1201_v54, %v1200_v57 }
 0x113   : > { %v1216_v38 = vsel %vm1145_vm7, %v1215_v18, %v1214_v25  ;;  %v532_v1 = vrot.slane %v253_v60, %v1574_v11  ;;  %v522_v7 = vrot.slane %v508_v47, %v1574_v11  ;;  %v523_v8 = vcombine.high %v515_v63, %v515_v63 }
 0x114   : > { %v1247_v6 = vpack.c.b16 %v1216_v38, %v1202_v5  ;;  %v1482_v10 = vrot.slane %v515_v63, 9  ;;  %v1222_v12 = vsel %vm1133_vm3, %v1221_v3, %v1220_v61  ;;  %v539_v17 = vrot.slane %v525_v52, %v1574_v11 }
 0x115   : > { %v540_v22 = vcombine.high %v532_v1, %v532_v1  ;;  %v1486_v23 = vrot.slane %v532_v1, 9  ;;  %v524_v24 = vcombine.high %v522_v7, %v522_v7  ;;  %v1483_v53 = vrot.slane %v523_v8, 9 }
 0x116   : > { %1509 = vmatprep.mubr.msk.bf16.mxu1 %vm1249_vm8, %v1247_v6  ;;  %v1484_v29 = vrot.slane %v522_v7, 9  ;;  %v854_v31 = vadd.f32 %v1482_v10, %v515_v63  ;;  %v541_v32 = vcombine.high %v539_v17, %v539_v17  ;;  %v1488_v27 = vrot.slane %v539_v17, 9 }
 0x117   : > { %v1487_v36 = vrot.slane %v540_v22, 9  ;;  %v858_v13 = vadd.f32 %v1486_v23, %v532_v1  ;;  %v1485_v40 = vrot.slane %v524_v24, 9  ;;  %v855_v21 = vadd.f32 %v1483_v53, %v523_v8  ;;  %v1490_v23 = vld [vmem:[%s1769_s2] ss:$0 sm:$0xff] }
 0x118   : > { %v856_v43 = vadd.f32 %v1484_v29, %v522_v7  ;;  %v918_v37 = vmul.f32 0.25, %v854_v31  ;;  %v1489_v28 = vrot.slane %v541_v32, 9  ;;  %v860_v42 = vadd.f32 %v1488_v27, %v539_v17 }
 0x119   : > { %v859_v41 = vadd.f32 %v1487_v36, %v540_v22  ;;  %v922_v11 = vmul.f32 0.25, %v858_v13  ;;  %v1117_v44 = vunpack.c.l.b16 %v981_v35  ;;  %v857_v45 = vadd.f32 %v1485_v40, %v524_v24 }
 0x11a   : > { %v919_v26 = vmul.f32 0.25, %v855_v21  ;;  %v920_v46 = vmul.f32 0.25, %v856_v43  ;;  %v861_v48 = vadd.f32 %v1489_v28, %v541_v32  ;;  %v924_v39 = vmul.f32 0.25, %v860_v42 }
 0x11b   : > { %v923_v49 = vmul.f32 0.25, %v859_v41  ;;  %v986_v15 = vpack.c.bf16 %v922_v11, %v922_v11  ;;  %v921_v19 = vmul.f32 0.25, %v857_v45  ;;  %v982_v20 = vpack.c.bf16 %v918_v37, %v918_v37 }
 0x11c   : > { %v983_v50 = vpack.c.bf16 %v919_v26, %v919_v26  ;;  %v984_v3 = vpack.c.bf16 %v920_v46, %v920_v46  ;;  %v925_v14 = vmul.f32 0.25, %v861_v48  ;;  %v988_v33 = vpack.c.bf16 %v924_v39, %v924_v39 }
 0x11d   : > { %v987_v30 = vpack.c.bf16 %v923_v49, %v923_v49  ;;  %v1122_v51 = vunpack.c.l.b16 %v986_v15  ;;  %v1225_v4 = vrot.slane %v1728_v62, 3  ;;  %v985_v56 = vpack.c.bf16 %v921_v19, %v921_v19 }
 0x11e   : > { %v1119_v16 = vunpack.c.l.b16 %v983_v50  ;;  %v1120_v35 = vunpack.c.l.b16 %v984_v3  ;;  %v1224_v54 = vsel %vm1136_vm4, %v1223_v2, %v1222_v12  ;;  %v989_v0 = vpack.c.bf16 %v925_v14, %v925_v14 }
 0x11f   : > { %v1123_v55 = vunpack.c.l.b16 %v987_v30  ;;  %v1124_v18 = vunpack.c.l.b16 %v988_v33  ;;  %v1118_v57 = vunpack.c.l.b16 %v982_v20  ;;  %v1121_v58 = vunpack.c.l.b16 %v985_v56 }
 0x120   : > { %v1231_v59 = vrot.slane %v1119_v16, 7  ;;  %v1233_v60 = vrot.slane %v1120_v35, 6  ;;  %v1227_v61 = vrot.slane %v1730_v9, 2  ;;  %v1125_v34 = vunpack.c.l.b16 %v989_v0 }
 0x121   : > { %v1237_v25 = vrot.slane %v1122_v51, 4  ;;  %v1235_v63 = vrot.slane %v1121_v58, 5  ;;  %v1239_v62 = vrot.slane %v1123_v55, 3  ;;  %v1226_v52 = vsel %vm1139_vm5, %v1225_v4, %v1224_v54 }
 0x122   : > { %v1232_v47 = vsel %vm1127_vm1, %v1231_v59, %v1118_v57  ;;  %v1241_v2 = vrot.slane %v1124_v18, 2  ;;  %v1229_v1 = vrot.slane %v1117_v44, 1  ;;  %v1243_v6 = vrot.slane %v1125_v34, 1 }
 0x123   : > { %v1234_v5 = vsel %vm1130_vm2, %v1233_v60, %v1232_v47  ;;  %v1228_v8 = vsel %vm1142_vm6, %v1227_v61, %v1226_v52 }
 0x124   : > { %v1236_v38 = vsel %vm1133_vm3, %v1235_v63, %v1234_v5  ;;  %v1230_v12 = vsel %vm1145_vm7, %v1229_v1, %v1228_v8 }
 0x125   : > { %v1238_v7 = vsel %vm1136_vm4, %v1237_v25, %v1236_v38 }
 0x126   : > { %v1240_v9 = vsel %vm1139_vm5, %v1239_v62, %v1238_v7 }
 0x127   : > { %v1242_v10 = vsel %vm1142_vm6, %v1241_v2, %v1240_v9 }
 0x128   : > { %v1244_v17 = vsel %vm1145_vm7, %v1243_v6, %v1242_v10 }
 0x129   : > { %v1248_v22 = vpack.c.b16 %v1244_v17, %v1230_v12 }
 0x12b   : > { %1510 = vmatmul.mubr.msk.bf16.vlgmr.msra.gmra.mrb[0].mxu1 %vm1249_vm8, %v1248_v22 }
 0x1bd   : > { %v1507_v24 = vpop.f32.mrb[0].mxu0 }
 0x1be   : > { %v1300_v53 = vpop.f32.mrb[1].mxu0  ;;  %v1309_v27 = vadd.f32 %v1507_v24, %v1490_v23 }
 0x1bf   : > { %v1508_v29 = vpop.f32.mrb[2].mxu0  ;;  %v1301_v31 = vadd.f32 %v1490_v23, %v1300_v53 }
 0x1c0   : > { %v1303_v32 = vpop.f32.mrb[3].mxu0  ;;  %v1312_v13 = vadd.f32 %v1508_v29, %v1490_v23 }
 0x1c1   : > { %1331 = vxpose.xlu1.b32.start [1/8] (short) (narrow) %v1301_v31, 8  ;;  %v1304_v36 = vadd.f32 %v1490_v23, %v1303_v32 }
 0x1c5   : > { %1332 = vxpose.xlu1.b32.cont [2/8] (short) (narrow) %v1304_v36, 8 }
 0x1c9   : > { %1333 = vxpose.xlu1.b32.cont [3/8] (short) (narrow) %v1309_v27, 8 }
 0x1cd   : > { %1334 = vxpose.xlu1.b32.cont [4/8] (short) (narrow) %v1312_v13, 8 }
 0x1fe   : > { %v1511_v40 = vpop.f32.mrb[0].mxu1 }
 0x1ff   : > { %v1316_v21 = vpop.f32.mrb[1].mxu1  ;;  %v1325_v42 = vadd.f32 %v1511_v40, %v1490_v23 }
 0x200   : > { %v1317_v43 = vadd.f32 %v1490_v23, %v1316_v21  ;;  %v1512_v37 = vpop.f32.mrb[2].mxu1 }
 0x201   : > { %v1319_v28 = vpop.f32.mrb[3].mxu1  ;;  %v1328_v11 = vadd.f32 %v1512_v37, %v1490_v23 }
 0x202   : > { %1335 = vxpose.xlu1.b32.cont [5/8] (short) (narrow) %v1317_v43, 8  ;;  %v1320_v41 = vadd.f32 %v1490_v23, %v1319_v28 }
 0x206   : > { %1336 = vxpose.xlu1.b32.cont [6/8] (short) (narrow) %v1320_v41, 8 }
 0x20a   : > { %1337 = vxpose.xlu1.b32.cont [7/8] (short) (narrow) %v1325_v42, 8 }
 0x20e   : > { %1338 = vxpose.xlu1.b32.end [8/8] (short) (narrow) %v1328_v11, 8 }
 0x272   : > { %v1347_v44 = vpop.trf.xlu1 }
 0x273   : > { %1364 = vst.msk [vmem:[%s168_s25] sm:$0x3] %vm1363_vm9, %v1347_v44 }
 0x274 PF: > { %s13_s12 = sadd.s32 1, %s1534_s12  }
 0x275   : > { %p10_p4 = scmp.ge.s32.totalorder %s13_s12, 4  }
 0x277   :  { %12 = sbr.rel (!%p10_p4) target bundleno = 1 (0x1), region = 62 }

</bundles_post_ra>
